<compile_context>
chip_gen: v7x
topology: tpu7x:2x2x1
jax: 0.10.0
libtpu: 0.0.40
codegen_flags: <defaults>
</compile_context>

<pallas_src>
import jax
import jax.numpy as jnp
from jax import lax
from jax.experimental import pallas as pl
from jax.experimental.pallas import tpu as pltpu

_EPS = 1e-5  # default eps of both nn.InstanceNorm2d and nn.BatchNorm2d


def _make_ibn_kernel(N, C, HW, eps):
    inv_hw = 1.0 / float(HW)
    inv_nhw = 1.0 / float(N * HW)

    def kernel(x_ref, p_ref, out_ref):
        # x: (N, C, HW)  -- HW on the lane axis (lane-dense).
        x = x_ref[...].astype(jnp.float32)

        # One pass over x for both reductions (lane reduction on the XLU).
        s = jnp.sum(x, axis=2, keepdims=True)            # (N, C, 1)  Σx
        ss = jnp.sum(x * x, axis=2, keepdims=True)       # (N, C, 1)  Σx²

        # InstanceNorm stats: per (n, c) over HW (biased variance).
        mean_in = s * inv_hw
        var_in = ss * inv_hw - mean_in * mean_in

        # BatchNorm stats (training mode): per c over (N, HW), biased variance.
        mean_bn = jnp.sum(s, axis=0, keepdims=True) * inv_nhw        # (1, C, 1)
        var_bn = jnp.sum(ss, axis=0, keepdims=True) * inv_nhw - mean_bn * mean_bn

        # Coalesced per-channel params: row 0 = gamma, row 1 = beta,
        # row 2 = mask (1.0 for IN channels, 0.0 for BN channels).
        gamma = p_ref[0:1]                               # (1, C, 1)
        beta = p_ref[1:2]                                # (1, C, 1)
        mask = p_ref[2:3]                                # (1, C, 1)

        # Blend IN / BN statistics per channel on the tiny stats tensors.
        mean = mask * mean_in + (1.0 - mask) * mean_bn   # (N, C, 1)
        var = mask * var_in + (1.0 - mask) * var_bn      # (N, C, 1)

        scale = lax.rsqrt(var + eps) * gamma             # (N, C, 1)
        shift = beta - mean * scale                      # (N, C, 1)

        # Single fused lane-dense elementwise pass + one full (unmasked) store.
        out_ref[...] = (x * scale + shift).astype(out_ref.dtype)

    return kernel


def ibn_forward(x_nchw, params, *, ratio=0.5, eps=_EPS):
    """Pallas forward of the PyTorch `IBN` module.  x_nchw: (N, C, H, W)."""
    N, C, H, W = x_nchw.shape
    half = int(C * ratio)
    assert 0 < half < C, "need 0 < half < planes"
    assert C - half <= half, "torch.split(x, half, 1) must yield exactly 2 usable chunks"
    HW = H * W

    # NCHW -> (N, C, H*W): pure reshape, no transpose / pad / extra HBM pass.
    x3 = x_nchw.reshape(N, C, HW)

    # Coalesce all per-channel parameters into ONE small buffer: (3, C, 1).
    gamma = jnp.concatenate([params["in_w"], params["bn_w"]]).astype(jnp.float32)
    beta = jnp.concatenate([params["in_b"], params["bn_b"]]).astype(jnp.float32)
    mask = (jnp.arange(C) < half).astype(jnp.float32)
    p = jnp.stack([gamma, beta, mask], axis=0).reshape(3, C, 1)

    kernel = _make_ibn_kernel(N, C, HW, eps)
    out3 = pl.pallas_call(
        kernel,
        out_shape=jax.ShapeDtypeStruct((N, C, HW), x_nchw.dtype),
        grid=(1,),
        in_specs=[
            pl.BlockSpec((N, C, HW), lambda i: (0, 0, 0)),
            pl.BlockSpec((3, C, 1), lambda i: (0, 0, 0)),
        ],
        out_specs=pl.BlockSpec((N, C, HW), lambda i: (0, 0, 0)),
        compiler_params=pltpu.CompilerParams(dimension_semantics=("arbitrary",)),
    )(x3, p)
    return out3.reshape(N, C, H, W)


def ibn_reference(x, params, *, half, eps=_EPS):
    """Pure-JAX (XLA) reference with PyTorch IBN semantics, NCHW."""
    x1, x2 = x[:, :half], x[:, half:]
    # InstanceNorm2d(affine=True), per-(n,c) stats over (H, W), biased var.
    m1 = jnp.mean(x1, axis=(2, 3), keepdims=True)
    v1 = jnp.mean(jnp.square(x1 - m1), axis=(2, 3), keepdims=True)
    o1 = (x1 - m1) * lax.rsqrt(v1 + eps) * params["in_w"][None, :, None, None] \
        + params["in_b"][None, :, None, None]
    # BatchNorm2d (training mode), per-c stats over (N, H, W), biased var.
    m2 = jnp.mean(x2, axis=(0, 2, 3), keepdims=True)
    v2 = jnp.mean(jnp.square(x2 - m2), axis=(0, 2, 3), keepdims=True)
    o2 = (x2 - m2) * lax.rsqrt(v2 + eps) * params["bn_w"][None, :, None, None] \
        + params["bn_b"][None, :, None, None]
    return jnp.concatenate([o1, o2], axis=1)


if __name__ == "__main__":
    keys = iter(jax.random.split(jax.random.PRNGKey(0), 32))

    def make_params(C, half):
        return {
            "in_w": 1.0 + 0.1 * jax.random.normal(next(keys), (half,), jnp.float32),
            "in_b": 0.10 * jax.random.normal(next(keys), (half,), jnp.float32),
            "bn_w": 1.0 + 0.1 * jax.random.normal(next(keys), (C - half,), jnp.float32),
            "bn_b": 0.10 * jax.random.normal(next(keys), (C - half,), jnp.float32),
        }

    for (N, C, H, W) in [(2, 4, 16, 16), (2, 8, 16, 16)]:
        half = C // 2
        x = jax.random.normal(next(keys), (N, C, H, W), jnp.float32)
        params = make_params(C, half)

        out = jax.block_until_ready(ibn_forward(x, params, ratio=0.5))
        ref = ibn_reference(x, params, half=half)

        assert out.shape == (N, C, H, W) and out.dtype == jnp.float32
        if not jnp.allclose(out, ref, atol=2e-4, rtol=2e-4):
            raise AssertionError(
                f"mismatch at shape {(N, C, H, W)}: "
                f"max abs err = {jnp.max(jnp.abs(out - ref))}")

    print("KERNEL_OK")
</pallas_src>

<mosaic_0001>
module attributes {stable_mosaic.version = 11 : i64} {
  func.func @kernel(%arg0: i32, %arg1: memref<2x4x256xf32, #tpu.memory_space<vmem>>, %arg2: memref<3x4x1xf32, #tpu.memory_space<vmem>>, %arg3: memref<2x4x256xf32, #tpu.memory_space<vmem>>) attributes {dimension_semantics = [#tpu.dimension_semantics<arbitrary>], iteration_bounds = array<i64: 1>, scalar_prefetch = 0 : i64, scratch_operands = 0 : i64, tpu.core_type = #tpu.core_type<tc>, window_params = [{pipeline_mode = #tpu.pipeline_mode<synchronous>, transform_indices = @transform_0, window_bounds = array<i64: 2, 4, 256>}, {pipeline_mode = #tpu.pipeline_mode<synchronous>, transform_indices = @transform_1, window_bounds = array<i64: 3, 4, 1>}, {pipeline_mode = #tpu.pipeline_mode<synchronous>, transform_indices = @transform_2, window_bounds = array<i64: 2, 4, 256>}]} {
    %c0 = arith.constant 0 : index
    %c0_0 = arith.constant 0 : index
    %c0_1 = arith.constant 0 : index
    %0 = vector.load %arg1[%c0, %c0_0, %c0_1] : memref<2x4x256xf32, #tpu.memory_space<vmem>>, vector<2x4x256xf32>
    %cst = arith.constant dense<0.000000e+00> : vector<2x4xf32>
    %1 = vector.multi_reduction <add>, %0, %cst [2] : vector<2x4x256xf32> to vector<2x4xf32>
    %2 = vector.shape_cast %1 : vector<2x4xf32> to vector<2x4x1xf32>
    %3 = arith.mulf %0, %0 : vector<2x4x256xf32>
    %cst_2 = arith.constant dense<0.000000e+00> : vector<2x4xf32>
    %4 = vector.multi_reduction <add>, %3, %cst_2 [2] : vector<2x4x256xf32> to vector<2x4xf32>
    %5 = vector.shape_cast %4 : vector<2x4xf32> to vector<2x4x1xf32>
    %cst_3 = arith.constant 3.906250e-03 : f32
    %6 = vector.broadcast %cst_3 : f32 to vector<2x4x1xf32>
    %7 = arith.mulf %2, %6 : vector<2x4x1xf32>
    %cst_4 = arith.constant 3.906250e-03 : f32
    %8 = vector.broadcast %cst_4 : f32 to vector<2x4x1xf32>
    %9 = arith.mulf %5, %8 : vector<2x4x1xf32>
    %10 = arith.mulf %7, %7 : vector<2x4x1xf32>
    %11 = arith.subf %9, %10 : vector<2x4x1xf32>
    %cst_5 = arith.constant dense<0.000000e+00> : vector<4x1xf32>
    %12 = vector.multi_reduction <add>, %2, %cst_5 [0] : vector<2x4x1xf32> to vector<4x1xf32>
    %13 = vector.shape_cast %12 : vector<4x1xf32> to vector<1x4x1xf32>
    %cst_6 = arith.constant 0.001953125 : f32
    %14 = vector.broadcast %cst_6 : f32 to vector<1x4x1xf32>
    %15 = arith.mulf %13, %14 : vector<1x4x1xf32>
    %cst_7 = arith.constant dense<0.000000e+00> : vector<4x1xf32>
    %16 = vector.multi_reduction <add>, %5, %cst_7 [0] : vector<2x4x1xf32> to vector<4x1xf32>
    %17 = vector.shape_cast %16 : vector<4x1xf32> to vector<1x4x1xf32>
    %cst_8 = arith.constant 0.001953125 : f32
    %18 = vector.broadcast %cst_8 : f32 to vector<1x4x1xf32>
    %19 = arith.mulf %17, %18 : vector<1x4x1xf32>
    %20 = arith.mulf %15, %15 : vector<1x4x1xf32>
    %21 = arith.subf %19, %20 : vector<1x4x1xf32>
    %c0_9 = arith.constant 0 : index
    %c0_10 = arith.constant 0 : index
    %c0_11 = arith.constant 0 : index
    %22 = vector.load %arg2[%c0_9, %c0_10, %c0_11] : memref<3x4x1xf32, #tpu.memory_space<vmem>>, vector<1x4x1xf32>
    %c1 = arith.constant 1 : index
    %c0_12 = arith.constant 0 : index
    %c0_13 = arith.constant 0 : index
    %23 = vector.load %arg2[%c1, %c0_12, %c0_13] : memref<3x4x1xf32, #tpu.memory_space<vmem>>, vector<1x4x1xf32>
    %c2 = arith.constant 2 : index
    %c0_14 = arith.constant 0 : index
    %c0_15 = arith.constant 0 : index
    %24 = vector.load %arg2[%c2, %c0_14, %c0_15] : memref<3x4x1xf32, #tpu.memory_space<vmem>>, vector<1x4x1xf32>
    %25 = vector.broadcast %24 : vector<1x4x1xf32> to vector<2x4x1xf32>
    %26 = arith.mulf %25, %7 : vector<2x4x1xf32>
    %cst_16 = arith.constant 1.000000e+00 : f32
    %27 = vector.broadcast %cst_16 : f32 to vector<1x4x1xf32>
    %28 = arith.subf %27, %24 : vector<1x4x1xf32>
    %29 = arith.mulf %28, %15 : vector<1x4x1xf32>
    %30 = vector.broadcast %29 : vector<1x4x1xf32> to vector<2x4x1xf32>
    %31 = arith.addf %26, %30 : vector<2x4x1xf32>
    %32 = vector.broadcast %24 : vector<1x4x1xf32> to vector<2x4x1xf32>
    %33 = arith.mulf %32, %11 : vector<2x4x1xf32>
    %cst_17 = arith.constant 1.000000e+00 : f32
    %34 = vector.broadcast %cst_17 : f32 to vector<1x4x1xf32>
    %35 = arith.subf %34, %24 : vector<1x4x1xf32>
    %36 = arith.mulf %35, %21 : vector<1x4x1xf32>
    %37 = vector.broadcast %36 : vector<1x4x1xf32> to vector<2x4x1xf32>
    %38 = arith.addf %33, %37 : vector<2x4x1xf32>
    %cst_18 = arith.constant 9.99999974E-6 : f32
    %39 = vector.broadcast %cst_18 : f32 to vector<2x4x1xf32>
    %40 = arith.addf %38, %39 : vector<2x4x1xf32>
    %41 = math.rsqrt %40 : vector<2x4x1xf32>
    %42 = vector.broadcast %22 : vector<1x4x1xf32> to vector<2x4x1xf32>
    %43 = arith.mulf %41, %42 : vector<2x4x1xf32>
    %44 = arith.mulf %31, %43 : vector<2x4x1xf32>
    %45 = vector.broadcast %23 : vector<1x4x1xf32> to vector<2x4x1xf32>
    %46 = arith.subf %45, %44 : vector<2x4x1xf32>
    %47 = vector.broadcast %43 : vector<2x4x1xf32> to vector<2x4x256xf32>
    %48 = arith.mulf %0, %47 : vector<2x4x256xf32>
    %49 = vector.broadcast %46 : vector<2x4x1xf32> to vector<2x4x256xf32>
    %50 = arith.addf %48, %49 : vector<2x4x256xf32>
    %c0_19 = arith.constant 0 : index
    %c0_20 = arith.constant 0 : index
    %c0_21 = arith.constant 0 : index
    %51 = vector.load %arg3[%c0_19, %c0_20, %c0_21] : memref<2x4x256xf32, #tpu.memory_space<vmem>>, vector<2x4x256xf32>
    tpu.vector_store %arg3[%c0_19, %c0_20, %c0_21], %50 {strides = array<i32>} : memref<2x4x256xf32, #tpu.memory_space<vmem>>, vector<2x4x256xf32>,
    return
  }
  func.func @transform_0(%arg0: i32) -> (i32, i32, i32) {
    %c0_i32 = arith.constant 0 : i32
    %c0_i32_0 = arith.constant 0 : i32
    %c0_i32_1 = arith.constant 0 : i32
    %c0_i32_2 = arith.constant 0 : i32
    return %c0_i32, %c0_i32_0, %c0_i32_1 : i32, i32, i32
  }
  func.func @transform_1(%arg0: i32) -> (i32, i32, i32) {
    %c0_i32 = arith.constant 0 : i32
    %c0_i32_0 = arith.constant 0 : i32
    %c0_i32_1 = arith.constant 0 : i32
    %c0_i32_2 = arith.constant 0 : i32
    return %c0_i32, %c0_i32_0, %c0_i32_1 : i32, i32, i32
  }
  func.func @transform_2(%arg0: i32) -> (i32, i32, i32) {
    %c0_i32 = arith.constant 0 : i32
    %c0_i32_0 = arith.constant 0 : i32
    %c0_i32_1 = arith.constant 0 : i32
    %c0_i32_2 = arith.constant 0 : i32
    return %c0_i32, %c0_i32_0, %c0_i32_1 : i32, i32, i32
  }
}

</mosaic_0001>

<bundles_post_ra>
// kernel: tpu_custom_call.1
= control target key start
LH: loop header
LB: loop body
LE: loop exit
PB: predicated region body
PF: predicated region fallthrough
CT: control target
= control target key end

     0   :  { %7 = vsyncpa [#allocation3], 0  ;;  %s330_s0 = inlined_call_operand.hbm [shape: f32[2,4,256], index: 0, kind: input, shape index: {}]   ;;  %s331_s1 = inlined_call_operand.vmem [shape: f32[3,4,1], index: 1, kind: input, shape index: {}]   ;;  %s332_s2 = inlined_call_operand.hbm [shape: f32[2,4,256], index: 2, kind: output, shape index: {}]  }
   0x1   :  { %8 = vsyncpa [#allocation4], 0  ;;  %s242_s9 = smov [#allocation2]   ;;  %s194_s13 = scalar_lea.hbm %s330_s0, 256 }
   0x2   :  { %s14_s10 = sshll.u32 %s242_s9, 4  ;;  %p195_p0 = scmp.ne.s32.totalorder %s330_s0, %s194_s13  ;;  %s15_s10 = int_to_ptr.vmem [resolvable:$true] %s14_s10 }
   0x3   :  { %p198_p1 = scmp.lt.u32.totalorder %s194_s13, %s330_s0 }
   0x5   :  { %p200_p2 = pnand %p198_p1, %p195_p0 }
   0x7   :  { %203 = shalt.err (!%p200_p2)
}
   0x8   :  { %s204_s18 = scalar_lea.vmem %s15_s10, 256  ;;  %p209_p4 = scmp.lt.s32.totalorder %s15_s10, %s15_s10 }
   0x9   :  { %p205_p3 = scmp.ne.s32.totalorder %s15_s10, %s204_s18  ;;  %p210_p5 = scmp.lt.s32.totalorder %s204_s18, %s204_s18 }
   0xb   :  { %p211_p6 = por %p210_p5, %p209_p4 }
   0xd   :  { %p212_p7 = pnand %p211_p6, %p205_p3 }
   0xf   :  { %215 = shalt.err (!%p212_p7)
}
  0x10   :  { %s243_s19 = smov 128   ;;  %s244_s20 = smov 8  }
  0x11   :  { %20 = dma.hbm_to_vmem [thread:$0]  %s330_s0, 256, %s15_s10, [#allocation3], %s243_s19, %s243_s19, %s244_s20  }
  0x12   :  { %238 = dma.done.wait [#allocation3], 256  }
  0x13   :  { %239 = vsyncadd [#allocation3], 4294967040  ;;  %vm34_vm0 = vcmask 1043456   ;;  %v278_v0 = vld [vmem:[#allocation2] sm:$0xff]  ;;  %v280_v1 = vld [vmem:[#allocation2 + $0x8] sm:$0xff]  ;;  %v245_v20 = vmov 0  }
  0x14   :  { %v30_v2 = vcombine.high %v278_v0, %v278_v0  ;;  %v35_v3 = vsel %vm34_vm0, %v278_v0, 0.0  ;;  %v45_v4 = vmul.f32 %v278_v0, %v278_v0  ;;  %v31_v5 = vcombine.high %v280_v1, %v280_v1  ;;  %187 = vset.pattern.permute.xlu1 %v245_v20  ;;  %186 = vset.pattern.permute.xlu0 %v245_v20  ;;  %v179_v42 = vld [vmem:[%s331_s1 + $0x8] sm:$0xf]  ;;  %v81_v53 = vld [vmem:[%s331_s1] sm:$0xf] }
  0x15   :  { %v40_v6 = vsel %vm34_vm0, %v280_v1, 0.0  ;;  %v46_v7 = vmul.f32 %v280_v1, %v280_v1  ;;  %v88_v43 = vsub.f32 1.0, %v179_v42  ;;  %v178_v61 = vld [vmem:[%s331_s1 + $0x4] sm:$0xf]  ;;  %s247_s1 = smov [#allocation5]  }
  0x16   :  { %v36_v8 = vsel %vm34_vm0, %v30_v2, 0.0  ;;  %v49_v9 = vcombine.high %v45_v4, %v45_v4  ;;  %v53_v10 = vsel %vm34_vm0, %v45_v4, 0.0  ;;  %v41_v11 = vsel %vm34_vm0, %v31_v5, 0.0  ;;  %s166_s28 = sshll.u32 %s247_s1, 4  ;;  %s167_s28 = int_to_ptr.vmem [resolvable:$true] %s166_s28 }
  0x17   :  { %v37_v12 = vadd.f32 %v36_v8, %v35_v3  ;;  %v50_v13 = vcombine.high %v46_v7, %v46_v7  ;;  %v58_v15 = vsel %vm34_vm0, %v46_v7, 0.0  ;;  %v42_v17 = vadd.f32 %v41_v11, %v40_v6  ;;  %s216_s29 = scalar_lea.vmem %s167_s28, 256  ;;  %p221_p9 = scmp.lt.s32.totalorder %s167_s28, %s167_s28 }
  0x18   :  { %v54_v14 = vsel %vm34_vm0, %v49_v9, 0.0  ;;  %v246_v5 = vmov 839922192   ;;  %v118_v7 = vlaneseq  ;;  %p217_p8 = scmp.ne.s32.totalorder %s167_s28, %s216_s29  ;;  %p222_p10 = scmp.lt.s32.totalorder %s216_s29, %s216_s29 }
  0x19   :  { %38 = vadd.xlane.f32.xlu0 %v37_v12  ;;  %v55_v16 = vadd.f32 %v54_v14, %v53_v10  ;;  %v59_v18 = vsel %vm34_vm0, %v50_v13, 0.0  ;;  %v116_v6 = vunpack.c.l.s4 %v246_v5 }
  0x1a   :  { %v60_v19 = vadd.f32 %v59_v18, %v58_v15  ;;  %v119_v9 = vshrl.u32 %v118_v7, 7  ;;  %p223_p11 = por %p222_p10, %p221_p9 }
  0x1b   :  { %56 = vadd.xlane.f32.xlu1 %v55_v16  ;;  %v117_v8 = vunpack.c.0.s8 %v116_v6 }
  0x1c   :  { %p224_p12 = pnand %p223_p11, %p217_p8 }
  0x1d   :  { %43 = vadd.xlane.f32.xlu0 %v42_v17  ;;  %v120_v10 = vsub.s32 %v117_v8, %v119_v9 }
  0x1f   :  { %61 = vadd.xlane.f32.xlu1 %v60_v19 }
  0xa6   :  { %v39_v21 = vpop.xlane.xlu0 %38 }
  0xa7   :  { %v63_v23 = vmul.f32 0.00390625, %v39_v21  ;;  %v71_v25 = vsel %vm34_vm0, %v39_v21, 0.0 }
  0xa8   :  { %v57_v22 = vpop.xlane.xlu1 %56 }
  0xa9   :  { %v67_v30 = vmul.f32 %v63_v23, %v63_v23  ;;  %v65_v31 = vmul.f32 0.00390625, %v57_v22  ;;  %v75_v34 = vsel %vm34_vm0, %v57_v22, 0.0  ;;  %v86_v54 = vmul.f32 %v179_v42, %v63_v23 }
  0xaa   :  { %v44_v24 = vpop.xlane.xlu0 %43 }
  0xab   :  { %v64_v26 = vmul.f32 0.00390625, %v44_v24  ;;  %v72_v27 = vsel %vm34_vm0, %v44_v24, 0.0  ;;  %v69_v39 = vsub.f32 %v65_v31, %v67_v30 }
  0xac   :  { %v73_v28 = vadd.f32 %v72_v27, %v71_v25  ;;  %v62_v29 = vpop.xlane.xlu1 %61 }
  0xad   :  { %v68_v32 = vmul.f32 %v64_v26, %v64_v26  ;;  %v66_v33 = vmul.f32 0.00390625, %v62_v29  ;;  %v76_v36 = vsel %vm34_vm0, %v62_v29, 0.0  ;;  %v92_v45 = vmul.f32 %v179_v42, %v69_v39 }
  0xae   :  { %v74_v35 = vmul.f32 0.001953125, %v73_v28  ;;  %v77_v37 = vadd.f32 %v76_v36, %v75_v34  ;;  %v87_v59 = vmul.f32 %v179_v42, %v64_v26 }
  0xaf   :  { %v70_v40 = vsub.f32 %v66_v33, %v68_v32 }
  0xb0   :  { %v79_v38 = vmul.f32 %v74_v35, %v74_v35  ;;  %v78_v41 = vmul.f32 0.001953125, %v77_v37  ;;  %v89_v52 = vmul.f32 %v88_v43, %v74_v35 }
  0xb1   :  { %v93_v46 = vmul.f32 %v179_v42, %v70_v40 }
  0xb2   :  { %v80_v44 = vsub.f32 %v78_v41, %v79_v38  ;;  %v90_v57 = vadd.f32 %v89_v52, %v86_v54  ;;  %v91_v63 = vadd.f32 %v89_v52, %v87_v59 }
  0xb4   :  { %v94_v47 = vmul.f32 %v88_v43, %v80_v44 }
  0xb6   :  { %v95_v48 = vadd.f32 %v94_v47, %v92_v45  ;;  %v96_v49 = vadd.f32 %v94_v47, %v93_v46 }
  0xb8   :  { %v97_v50 = vadd.f32 1e-05, %v95_v48  ;;  %v98_v51 = vadd.f32 1e-05, %v96_v49 }
  0xba   :  { %190 = vrsqrt.f32 %v97_v50 }
  0xbb   :  { %192 = vrsqrt.f32 %v98_v51 }
  0xc4   :  { %v191_v55 = vpop.eup %190 }
  0xc5   :  { %v193_v56 = vpop.eup %192  ;;  %v101_v58 = vmul.f32 %v191_v55, %v81_v53 }
  0xc6   :  { %v102_v60 = vmul.f32 %v193_v56, %v81_v53 }
  0xc7   :  { %109 = vperm.xlu0 %186, %v101_v58   ;;  %v103_v62 = vmul.f32 %v101_v58, %v90_v57 }
  0xc8   :  { %113 = vperm.xlu1 %187, %v102_v60   ;;  %v104_v3 = vmul.f32 %v102_v60, %v91_v63 }
  0xc9   :  { %v105_v2 = vsub.f32 %v178_v61, %v103_v62 }
  0xca   :  { %v106_v4 = vsub.f32 %v178_v61, %v104_v3 }
  0xcc   :  { %135 = vperm.xlu1 %187, %v105_v2  }
  0xd0   :  { %139 = vperm.xlu1 %187, %v106_v4  }
 0x146   :  { %v110_v11 = vpop.permute.xlu0 %109 }
 0x147   :  { %v114_v12 = vpop.permute.xlu1 %113  ;;  %v121_v13 = vrot.slane %v110_v11, %v120_v10 }
 0x148   :  { %v128_v15 = vrot.slane %v114_v12, %v120_v10 }
 0x149   :  { %v131_v16 = vmul.f32 %v121_v13, %v278_v0 }
 0x14a   :  { %v132_v20 = vmul.f32 %v128_v15, %v280_v1 }
 0x14b   :  { %v136_v14 = vpop.permute.xlu1 %135 }
 0x14c   :  { %v147_v17 = vrot.slane %v136_v14, %v120_v10 }
 0x14e   :  { %v157_v18 = vadd.f32 %v147_v17, %v131_v16 }
 0x14f   :  { %v140_v19 = vpop.permute.xlu1 %139 }
 0x150   :  { %159 = vst [vmem:[#allocation5] sm:$0xff] %v157_v18  ;;  %v154_v21 = vrot.slane %v140_v19, %v120_v10 }
 0x152   :  { %v158_v22 = vadd.f32 %v154_v21, %v132_v20 }
 0x154   :  { %160 = vst [vmem:[#allocation5 + $0x8] sm:$0xff] %v158_v22 }
 0x155   :  { %227 = shalt.err (!%p224_p12)
}
 0x156   :  { %s228_s4 = scalar_lea.hbm %s332_s2, 256 }
 0x157   :  { %p229_p13 = scmp.ne.s32.totalorder %s332_s2, %s228_s4  ;;  %p232_p0 = scmp.lt.u32.totalorder %s228_s4, %s332_s2 }
 0x159   :  { %p234_p1 = pnand %p232_p0, %p229_p13 }
 0x15b   :  { %237 = shalt.err (!%p234_p1)
}
 0x15c   :  { %172 = dma.vmem_to_hbm [thread:$0]  %s167_s28, 256, %s332_s2, [#allocation4], %s243_s19, %s243_s19, %s244_s20  }
 0x15d   :  { %240 = dma.done.wait [#allocation4], 256  }
 0x15e   :  { %241 = vsyncadd [#allocation4], 4294967040 }
 0x15f   :  { %176 = vsyncpa [#allocation3], 1 }
 0x160   :  { %177 = vsyncpa [#allocation4], 1 }

</bundles_post_ra>
